<compile_context>
chip_gen: v7x
topology: tpu7x:2x2x1
jax: 0.10.0
libtpu: 0.0.40
codegen_flags: <defaults>
</compile_context>

<pallas_src>
import math

import jax
import jax.numpy as jnp
from jax.experimental import pallas as pl
from jax.experimental.pallas import tpu as pltpu

NEG_SLOPE = 0.01  # nn.LeakyReLU default negative_slope


def _leaky_gate_kernel(x_ref, w_ref, b_ref, o_ref):
    # x_ref: (block_rows, block_d); w_ref/b_ref: (1, block_d) broadcast on rows.
    y = x_ref[...] * w_ref[...] + b_ref[...]
    # LeakyReLU with 0 < slope < 1  <=>  max(y, slope*y)  (2 VALU ops/vreg).
    o_ref[...] = jnp.maximum(y, NEG_SLOPE * y).astype(o_ref.dtype)


def leaky_gate(x, weight, bias, *,
               target_block_bytes=2 * 1024 * 1024,  # per-block; 2x2 buffers ~8 MiB
               max_block_d=2048):
    """LeakyGate forward.

    x      : (rows, fields) or (rows, fields, emb)
    weight : (1, input_size) where input_size = fields (* emb)
    bias   : (1, input_size)
    """
    orig_shape = x.shape
    x2d = x.reshape((x.shape[0], -1)) if x.ndim > 2 else x
    rows, d = x2d.shape
    assert weight.shape == (1, d) and bias.shape == (1, d)

    out_dtype = jnp.result_type(x2d.dtype, weight.dtype, bias.dtype)

    # ---- lane-dense repacking for narrow / misaligned feature dims ---------
    # If d % 128 != 0 the output would need masked partial stores.  Fold k
    # rows into one kernel row so the lane dim becomes a multiple of 128.
    repack_k = 1
    if d % 128 != 0:
        k = 128 // math.gcd(d, 128)
        if k > 1 and rows % k == 0:
            repack_k = k
    if repack_k > 1:
        x_in = x2d.reshape((rows // repack_k, repack_k * d))
        w_in = jnp.tile(weight, (1, repack_k))
        b_in = jnp.tile(bias, (1, repack_k))
    else:
        x_in, w_in, b_in = x2d, weight, bias
    k_rows, k_d = x_in.shape

    # ---- tile sizing (safe on v7x's 64 MiB VMEM; large enough for roofline) -
    itemsize = jnp.dtype(out_dtype).itemsize
    if k_d % 128 == 0:
        block_d = min(k_d, max_block_d)          # multiple of 128
    else:
        block_d = k_d                            # full lane dim (always legal)

    rows_per_target = max(1, target_block_bytes // (block_d * itemsize))
    if k_rows <= 8:
        block_rows = k_rows                      # full dim: always legal
    else:
        block_rows = max(8, (min(rows_per_target, k_rows) // 8) * 8)

    grid = (pl.cdiv(k_rows, block_rows), pl.cdiv(k_d, block_d))

    out = pl.pallas_call(
        _leaky_gate_kernel,
        out_shape=jax.ShapeDtypeStruct((k_rows, k_d), out_dtype),
        grid_spec=pltpu.PrefetchScalarGridSpec(
            num_scalar_prefetch=0,
            grid=grid,
            in_specs=[
                pl.BlockSpec((block_rows, block_d), lambda i, j: (i, j)),
                pl.BlockSpec((1, block_d), lambda i, j: (0, j)),
                pl.BlockSpec((1, block_d), lambda i, j: (0, j)),
            ],
            out_specs=pl.BlockSpec((block_rows, block_d), lambda i, j: (i, j)),
        ),
        compiler_params=pltpu.CompilerParams(
            dimension_semantics=("parallel", "parallel")),
    )(x_in, w_in, b_in)

    if repack_k > 1:
        out = out.reshape((rows, d))
    if len(orig_shape) > 2:
        out = out.reshape(orig_shape)
    return out


def _reference(x, weight, bias):
    orig_shape = x.shape
    out = x.reshape((x.shape[0], -1)) if x.ndim > 2 else x
    out = out * weight + bias
    if len(orig_shape) > 2:
        out = out.reshape(orig_shape)
    return jnp.where(out >= 0, out, NEG_SLOPE * out)


if __name__ == "__main__":
    key = jax.random.PRNGKey(0)
    k_x, k_w = jax.random.split(key)

    # Main case: (num_rows, num_fields, embedding_size) = (8, 4, 32) -> d = 128
    num_rows, num_fields, emb = 8, 4, 32
    input_size = num_fields * emb

    x = jax.random.normal(k_x, (num_rows, num_fields, emb), dtype=jnp.float32)
    # Deterministic parameter init mirroring __init__:
    #   weight ~ Normal(0, 1) of shape (1, input_size), bias = zeros.
    weight = jax.random.normal(k_w, (1, input_size), dtype=jnp.float32)
    bias = jnp.zeros((1, input_size), dtype=jnp.float32)

    out = leaky_gate(x, weight, bias)
    jax.block_until_ready(out)
    ref = _reference(x, weight, bias)
    assert out.shape == x.shape
    assert jnp.allclose(out, ref, atol=1e-6, rtol=1e-6)

    # 2-D path, rows not a multiple of the row block (exercises the no-pad,
    # masked-boundary path), d a multiple of 128.
    x2 = jax.random.normal(k_x, (100, input_size), dtype=jnp.float32)
    out2 = leaky_gate(x2, weight, bias)
    jax.block_until_ready(out2)
    assert jnp.allclose(out2, _reference(x2, weight, bias), atol=1e-6, rtol=1e-6)

    # 2-D path with d not a multiple of 128 (exercises the lane-dense repack:
    # d=5, k=128, rows=256 divisible by k -> kernel sees (2, 640)).
    n_fields3 = 5
    x3 = jax.random.normal(k_x, (256, n_fields3), dtype=jnp.float32)
    w3 = jax.random.normal(k_w, (1, n_fields3), dtype=jnp.float32)
    b3 = jax.random.normal(key, (1, n_fields3), dtype=jnp.float32)
    out3 = leaky_gate(x3, w3, b3)
    jax.block_until_ready(out3)
    assert jnp.allclose(out3, _reference(x3, w3, b3), atol=1e-6, rtol=1e-6)

    print("KERNEL_OK")
</pallas_src>

<mosaic_0001>
module attributes {stable_mosaic.version = 11 : i64} {
  func.func @_leaky_gate_kernel(%arg0: i32, %arg1: i32, %arg2: memref<8x128xf32, #tpu.memory_space<vmem>>, %arg3: memref<1x128xf32, #tpu.memory_space<vmem>>, %arg4: memref<1x128xf32, #tpu.memory_space<vmem>>, %arg5: memref<8x128xf32, #tpu.memory_space<vmem>>) attributes {dimension_semantics = [#tpu.dimension_semantics<parallel>, #tpu.dimension_semantics<parallel>], iteration_bounds = array<i64: 1, 1>, scalar_prefetch = 0 : i64, scratch_operands = 0 : i64, tpu.core_type = #tpu.core_type<tc>, window_params = [{transform_indices = @transform_0, window_bounds = array<i64: 8, 128>}, {transform_indices = @transform_1, window_bounds = array<i64: 1, 128>}, {transform_indices = @transform_2, window_bounds = array<i64: 1, 128>}, {transform_indices = @transform_3, window_bounds = array<i64: 8, 128>}]} {
    %c0 = arith.constant 0 : index
    %c0_0 = arith.constant 0 : index
    %0 = vector.load %arg2[%c0, %c0_0] : memref<8x128xf32, #tpu.memory_space<vmem>>, vector<8x128xf32>
    %c0_1 = arith.constant 0 : index
    %c0_2 = arith.constant 0 : index
    %1 = vector.load %arg3[%c0_1, %c0_2] : memref<1x128xf32, #tpu.memory_space<vmem>>, vector<1x128xf32>
    %2 = vector.broadcast %1 : vector<1x128xf32> to vector<8x128xf32>
    %3 = arith.mulf %0, %2 : vector<8x128xf32>
    %c0_3 = arith.constant 0 : index
    %c0_4 = arith.constant 0 : index
    %4 = vector.load %arg4[%c0_3, %c0_4] : memref<1x128xf32, #tpu.memory_space<vmem>>, vector<1x128xf32>
    %5 = vector.broadcast %4 : vector<1x128xf32> to vector<8x128xf32>
    %6 = arith.addf %3, %5 : vector<8x128xf32>
    %cst = arith.constant 0.00999999977 : f32
    %7 = vector.broadcast %cst : f32 to vector<8x128xf32>
    %8 = arith.mulf %7, %6 : vector<8x128xf32>
    %9 = arith.maximumf %6, %8 : vector<8x128xf32>
    %c0_5 = arith.constant 0 : index
    %c0_6 = arith.constant 0 : index
    %10 = vector.load %arg5[%c0_5, %c0_6] : memref<8x128xf32, #tpu.memory_space<vmem>>, vector<8x128xf32>
    tpu.vector_store %arg5[%c0_5, %c0_6], %9 {strides = array<i32>} : memref<8x128xf32, #tpu.memory_space<vmem>>, vector<8x128xf32>,
    return
  }
  func.func @transform_0(%arg0: i32, %arg1: i32) -> (i32, i32) {
    %c0_i32 = arith.constant 0 : i32
    return %arg0, %arg1 : i32, i32
  }
  func.func @transform_1(%arg0: i32, %arg1: i32) -> (i32, i32) {
    %c0_i32 = arith.constant 0 : i32
    %c0_i32_0 = arith.constant 0 : i32
    return %c0_i32, %arg1 : i32, i32
  }
  func.func @transform_2(%arg0: i32, %arg1: i32) -> (i32, i32) {
    %c0_i32 = arith.constant 0 : i32
    %c0_i32_0 = arith.constant 0 : i32
    return %c0_i32, %arg1 : i32, i32
  }
  func.func @transform_3(%arg0: i32, %arg1: i32) -> (i32, i32) {
    %c0_i32 = arith.constant 0 : i32
    return %arg0, %arg1 : i32, i32
  }
}

</mosaic_0001>

<bundles_post_ra>
// kernel: tpu_custom_call.1
= control target key start
LH: loop header
LB: loop body
LE: loop exit
PB: predicated region body
PF: predicated region fallthrough
CT: control target
= control target key end

     0   :  { %8 = vsyncpa [#allocation3], 0  ;;  %s166_s0 = inlined_call_operand.hbm [shape: f32[8,128], index: 0, kind: input, shape index: {}]   ;;  %s167_s1 = inlined_call_operand.vmem [shape: f32[1,128], index: 1, kind: input, shape index: {}]   ;;  %s168_s2 = inlined_call_operand.vmem [shape: f32[1,128], index: 2, kind: input, shape index: {}]   ;;  %s169_s3 = inlined_call_operand.hbm [shape: f32[8,128], index: 3, kind: output, shape index: {}]  }
   0x1   :  { %9 = vsyncpa [#allocation4], 0  ;;  %s114_s12 = smov [#allocation2]   ;;  %s66_s16 = scalar_lea.hbm %s166_s0, 128 }
   0x2   :  { %s16_s13 = sshll.u32 %s114_s12, 4  ;;  %p67_p0 = scmp.ne.s32.totalorder %s166_s0, %s66_s16  ;;  %s17_s13 = int_to_ptr.vmem [resolvable:$true] %s16_s13 }
   0x3   :  { %p70_p1 = scmp.lt.u32.totalorder %s66_s16, %s166_s0 }
   0x5   :  { %p72_p2 = pnand %p70_p1, %p67_p0 }
   0x7   :  { %75 = shalt.err (!%p72_p2)
}
   0x8   :  { %s76_s21 = scalar_lea.vmem %s17_s13, 128  ;;  %p81_p4 = scmp.lt.s32.totalorder %s17_s13, %s17_s13 }
   0x9   :  { %p77_p3 = scmp.ne.s32.totalorder %s17_s13, %s76_s21  ;;  %p82_p5 = scmp.lt.s32.totalorder %s76_s21, %s76_s21 }
   0xb   :  { %p83_p6 = por %p82_p5, %p81_p4 }
   0xd   :  { %p84_p7 = pnand %p83_p6, %p77_p3 }
   0xf   :  { %87 = shalt.err (!%p84_p7)
}
  0x10   :  { %19 = dma.hbm_to_vmem [thread:$0]  %s166_s0, 128, %s17_s13, [#allocation3]  }
  0x11   :  { %110 = dma.done.wait [#allocation3], 128  }
  0x12   :  { %111 = vsyncadd [#allocation3], 4294967168  ;;  %v27_v0 = vld [vmem:[#allocation2] sm:$0xff]  ;;  %s115_s28 = smov [#allocation5]  }
  0x13   :  { %v62_v1 = vld [vmem:[%s167_s1] ss:$0 sm:$0xff]  ;;  %s53_s29 = sshll.u32 %s115_s28, 4  ;;  %s54_s29 = int_to_ptr.vmem [resolvable:$true] %s53_s29 }
  0x14   :  { %v63_v2 = vld [vmem:[%s168_s2] ss:$0 sm:$0xff]  ;;  %v35_v3 = vmul.f32 %v62_v1, %v27_v0  ;;  %s88_s0 = scalar_lea.vmem %s54_s29, 128  ;;  %p93_p9 = scmp.lt.s32.totalorder %s54_s29, %s54_s29 }
  0x15   :  { %p89_p8 = scmp.ne.s32.totalorder %s54_s29, %s88_s0  ;;  %p94_p10 = scmp.lt.s32.totalorder %s88_s0, %s88_s0 }
  0x16   :  { %v43_v4 = vadd.f32 %v63_v2, %v35_v3 }
  0x17   :  { %p95_p11 = por %p94_p10, %p93_p9 }
  0x18   :  { %v44_v5 = vmul.f32 0.01, %v43_v4 }
  0x19   :  { %p96_p12 = pnand %p95_p11, %p89_p8 }
  0x1a   :  { %v45_v6 = vmax.f32 %v43_v4, %v44_v5 }
  0x1c   :  { %46 = vst [vmem:[#allocation5] sm:$0xff] %v45_v6 }
  0x1d   :  { %99 = shalt.err (!%p96_p12)
}
  0x1e   :  { %s100_s4 = scalar_lea.hbm %s169_s3, 128 }
  0x1f   :  { %p101_p13 = scmp.ne.s32.totalorder %s169_s3, %s100_s4  ;;  %p104_p0 = scmp.lt.u32.totalorder %s100_s4, %s169_s3 }
  0x21   :  { %p106_p1 = pnand %p104_p0, %p101_p13 }
  0x23   :  { %109 = shalt.err (!%p106_p1)
}
  0x24   :  { %56 = dma.vmem_to_hbm [thread:$0]  %s54_s29, 128, %s169_s3, [#allocation4]  }
  0x25   :  { %112 = dma.done.wait [#allocation4], 128  }
  0x26   :  { %113 = vsyncadd [#allocation4], 4294967168 }
  0x27   :  { %60 = vsyncpa [#allocation3], 1 }
  0x28   :  { %61 = vsyncpa [#allocation4], 1 }

</bundles_post_ra>
